<compile_context>
chip_gen: v5e
topology: v5e:2x2
jax: 0.10.0
libtpu: 0.0.40
codegen_flags: <defaults>
</compile_context>

<pallas_src>
import math

import jax
import jax.numpy as jnp
from jax import lax
from jax.experimental import pallas as pl
from jax.experimental.pallas import tpu as pltpu

_LANE = 128


def _round_up(x, m):
    return (x + m - 1) // m * m


def _pad2d(a, rows, cols):
    return jnp.pad(a, ((0, rows - a.shape[0]), (0, cols - a.shape[1])))


# ----------------------------- kernels --------------------------------------

def _mlp2_kernel(x_ref, w1_ref, b1_ref, w2r_ref, b2_ref, o_ref):
    # fc1 on the MXU (f32 accumulate); bias + ReLU in f32 on the VPU.
    h = jnp.dot(x_ref[...], w1_ref[...], preferred_element_type=jnp.float32)
    h = jnp.maximum(h + b1_ref[...], 0.0)                      # (bm, Kp) f32
    # fc2 has out_features == 1: contract against the weight row so the result
    # is lane-dense (1, bm) (batch -> lanes) instead of a masked (bm, 1) store.
    y = lax.dot_general(
        w2r_ref[...], h.astype(w2r_ref.dtype),
        dimension_numbers=(((1,), (1,)), ((), ())),
        preferred_element_type=jnp.float32)                     # (1, bm)
    o_ref[0] = jnp.tanh(y + b2_ref[...]).astype(o_ref.dtype)


def _mlp3_kernel(x_ref, w1_ref, b1_ref, w2_ref, b2_ref, w3r_ref, b3_ref,
                 o_ref, acc_ref):
    # grid = (batch_tiles, k_tiles); k streams the fc2 contraction dimension.
    k = pl.program_id(1)

    @pl.when(k == 0)
    def _init():
        acc_ref[...] = jnp.zeros_like(acc_ref)

    # fc1 column-slab k:  (bm, dim) @ (dim, tk) -> (bm, tk); bias + ReLU f32.
    h1 = jnp.dot(x_ref[...], w1_ref[...], preferred_element_type=jnp.float32)
    h1 = jnp.maximum(h1 + b1_ref[...], 0.0)
    # stream fc2: accumulate (bm, tk) @ (tk, Hp) weight slabs into f32 scratch.
    acc_ref[...] += jnp.dot(h1.astype(w2_ref.dtype), w2_ref[...],
                            preferred_element_type=jnp.float32)

    @pl.when(k == pl.num_programs(1) - 1)
    def _finalize():
        h2 = jnp.maximum(acc_ref[...] + b2_ref[...], 0.0)       # (bm, Hp) f32
        y = lax.dot_general(
            w3r_ref[...], h2.astype(w3r_ref.dtype),
            dimension_numbers=(((1,), (1,)), ((), ())),
            preferred_element_type=jnp.float32)                 # (1, bm)
        o_ref[0] = jnp.tanh(y + b3_ref[...]).astype(o_ref.dtype)


# ----------------------------- wrapper ---------------------------------------

def net_eot_forward(x, params, *, deeper=False, block_m=None, block_k=None,
                    compute_dtype=jnp.float32):
    """Pallas forward pass for Net_EOT.

    x: [B, dim]; params: w*, b* with weights stored as [in, out] and biases as
    [1, out].  compute_dtype=jnp.bfloat16 feeds bf16 into the MXU (f32
    accumulation, f32 elementwise).
    """
    B, dim = x.shape
    in_bytes = jnp.dtype(compute_dtype).itemsize

    # ---- batch tiling: multiple-of-8 sublane tiles; pipelined over a grid ----
    # Default 256-row tiles; for v7x pass block_m <= B/2 if B < 512 so the
    # "parallel" axis has >= 2 programs to shard across the two TensorCores.
    if block_m is None:
        block_m = 256
    block_m = max(8, (block_m // 8) * 8)
    block_m = min(block_m, _round_up(B, 8))
    b_pad = _round_up(B, block_m)
    num_tiles = b_pad // block_m

    x_p = jnp.pad(x, ((0, b_pad - B), (0, 0))).astype(compute_dtype)

    out_shape = jax.ShapeDtypeStruct((num_tiles, 1, block_m), jnp.float32)

    if not deeper:
        w1, b1, w2, b2 = (params[k] for k in ("w1", "b1", "w2", "b2"))
        K = w1.shape[1]
        k_pad = _round_up(K, _LANE)

        w1_p = _pad2d(w1, dim, k_pad).astype(compute_dtype)
        b1_p = _pad2d(b1, 1, k_pad).astype(jnp.float32)
        w2_row = _pad2d(w2.T, 1, k_pad).astype(compute_dtype)   # (1, k_pad)
        b2_p = b2.astype(jnp.float32)                           # (1, 1)

        grid = (num_tiles,)
        in_specs = [
            pl.BlockSpec((block_m, dim), lambda i: (i, 0)),
            pl.BlockSpec((dim, k_pad), lambda i: (0, 0)),
            pl.BlockSpec((1, k_pad), lambda i: (0, 0)),
            pl.BlockSpec((1, k_pad), lambda i: (0, 0)),
            pl.BlockSpec((1, 1), lambda i: (0, 0)),
        ]
        out_specs = pl.BlockSpec((1, 1, block_m), lambda i: (i, 0, 0))
        args = (x_p, w1_p, b1_p, w2_row, b2_p)
        kernel = _mlp2_kernel
        scratch = ()
        dims_sem = ("parallel",)
        vmem_est = (2 * block_m * dim * in_bytes
                    + 3 * dim * k_pad * in_bytes
                    + 8 * k_pad * 4
                    + block_m * k_pad * 4
                    + 2 * block_m * 4)
    else:
        w1, b1, w2, b2, w3, b3 = (params[k] for k in
                                  ("w1", "b1", "w2", "b2", "w3", "b3"))
        H = w1.shape[1]                                          # 10 * K
        h_pad = _round_up(H, _LANE)
        if block_k is None:
            block_k = math.gcd(h_pad, 512)
        if block_k % _LANE != 0 or h_pad % block_k != 0:
            raise ValueError("block_k must be a multiple of 128 dividing the "
                             "padded hidden width")
        k_tiles = h_pad // block_k

        w1_p = _pad2d(w1, dim, h_pad).astype(compute_dtype)
        b1_p = _pad2d(b1, 1, h_pad).astype(jnp.float32)
        w2_p = _pad2d(w2, h_pad, h_pad).astype(compute_dtype)
        b2_p = _pad2d(b2, 1, h_pad).astype(jnp.float32)
        w3_row = _pad2d(w3.T, 1, h_pad).astype(compute_dtype)   # (1, h_pad)
        b3_p = b3.astype(jnp.float32)                           # (1, 1)

        grid = (num_tiles, k_tiles)
        in_specs = [
            pl.BlockSpec((block_m, dim), lambda i, k: (i, 0)),
            pl.BlockSpec((dim, block_k), lambda i, k: (0, k)),
            pl.BlockSpec((1, block_k), lambda i, k: (0, k)),
            pl.BlockSpec((block_k, h_pad), lambda i, k: (k, 0)),  # streamed fc2
            pl.BlockSpec((1, h_pad), lambda i, k: (0, 0)),
            pl.BlockSpec((1, h_pad), lambda i, k: (0, 0)),
            pl.BlockSpec((1, 1), lambda i, k: (0, 0)),
        ]
        out_specs = pl.BlockSpec((1, 1, block_m), lambda i, k: (i, 0, 0))
        args = (x_p, w1_p, b1_p, w2_p, b2_p, w3_row, b3_p)
        kernel = _mlp3_kernel
        scratch = (pltpu.VMEM((block_m, h_pad), jnp.float32),)
        dims_sem = ("parallel", "arbitrary")
        vmem_est = (2 * block_m * dim * in_bytes
                    + 2 * dim * block_k * in_bytes
                    + 2 * block_k * h_pad * in_bytes              # fc2 slab
                    + 6 * h_pad * 4
                    + block_m * h_pad * 4                         # accumulator
                    + 2 * block_m * 4)

    # Budget VMEM explicitly; stay within v7x's 64 MiB per TensorCore.
    vmem_limit = int(min(64 * 1024 * 1024, max(32 * 1024 * 1024, 2 * vmem_est)))

    out = pl.pallas_call(
        kernel,
        out_shape=out_shape,
        grid_spec=pltpu.PrefetchScalarGridSpec(
            num_scalar_prefetch=0,
            grid=grid,
            in_specs=in_specs,
            out_specs=out_specs,
            scratch_shapes=scratch,
        ),
        compiler_params=pltpu.CompilerParams(
            dimension_semantics=dims_sem,
            vmem_limit_bytes=vmem_limit),
    )(*args)

    # (num_tiles, 1, block_m) -> [B, 1]; row-major flatten preserves batch order.
    return out.reshape(b_pad)[:B].reshape(B, 1).astype(x.dtype)


# ----------------------- deterministic param init ----------------------------

def _linear_params(key, fan_in, fan_out):
    """Mimic torch.nn.Linear default init: U(-1/sqrt(fan_in), 1/sqrt(fan_in))."""
    kw, kb = jax.random.split(key)
    bound = 1.0 / jnp.sqrt(jnp.float32(fan_in))
    w = jax.random.uniform(kw, (fan_in, fan_out), jnp.float32, -bound, bound)
    b = jax.random.uniform(kb, (1, fan_out), jnp.float32, -bound, bound)
    return w, b


def make_params(key, dim, K, deeper=False):
    if deeper:
        k1, k2, k3 = jax.random.split(key, 3)
        w1, b1 = _linear_params(k1, dim, 10 * K)
        w2, b2 = _linear_params(k2, 10 * K, 10 * K)
        w3, b3 = _linear_params(k3, 10 * K, 1)
        return dict(w1=w1, b1=b1, w2=w2, b2=b2, w3=w3, b3=b3)
    k1, k2 = jax.random.split(key, 2)
    w1, b1 = _linear_params(k1, dim, K)
    w2, b2 = _linear_params(k2, K, 1)
    return dict(w1=w1, b1=b1, w2=w2, b2=b2)


def reference_forward(x, params, deeper=False):
    """Pure-JAX reference mirroring the PyTorch forward (unpadded params)."""
    h = jnp.maximum(x @ params["w1"] + params["b1"], 0.0)
    if deeper:
        h = jnp.maximum(h @ params["w2"] + params["b2"], 0.0)
        y = h @ params["w3"] + params["b3"]
    else:
        y = h @ params["w2"] + params["b2"]
    return jnp.tanh(y)


# ----------------------------------- main -------------------------------------

if __name__ == "__main__":
    key = jax.random.PRNGKey(0)
    kx1, kx2, kx3, kp_s, kp_d = jax.random.split(key, 5)

    dim, K = 32, 16

    # shallow, tiny batch (single batch tile)
    x1 = jax.random.normal(kx1, (8, dim), jnp.float32)
    p_s = make_params(kp_s, dim, K, deeper=False)
    y1 = net_eot_forward(x1, p_s, deeper=False)
    jax.block_until_ready(y1)
    assert y1.shape == (8, 1)
    assert jnp.max(jnp.abs(y1 - reference_forward(x1, p_s, deeper=False))) < 1e-4

    # shallow, ragged batch (B=10 padded to 16) with 2 batch tiles
    x2 = jax.random.normal(kx2, (10, dim), jnp.float32)
    y2 = net_eot_forward(x2, p_s, deeper=False, block_m=8)
    jax.block_until_ready(y2)
    assert y2.shape == (10, 1)
    assert jnp.max(jnp.abs(y2 - reference_forward(x2, p_s, deeper=False))) < 1e-4

    # deeper=True: 3 batch tiles x 2 fc2 reduction steps (streamed weight slabs)
    x3 = jax.random.normal(kx3, (24, dim), jnp.float32)
    p_d = make_params(kp_d, dim, K, deeper=True)
    y3 = net_eot_forward(x3, p_d, deeper=True, block_m=8, block_k=128)
    jax.block_until_ready(y3)
    y3_ref = reference_forward(x3, p_d, deeper=True)
    assert y3.shape == (24, 1)
    assert jnp.max(jnp.abs(y3 - y3_ref)) < 1e-4

    # bf16 MXU inputs (v6e/v7x fast path), f32 accumulation + f32 elementwise
    y3b = net_eot_forward(x3, p_d, deeper=True, block_m=8, block_k=128,
                          compute_dtype=jnp.bfloat16)
    jax.block_until_ready(y3b)
    assert y3b.shape == (24, 1)
    assert jnp.max(jnp.abs(y3b - y3_ref)) < 0.1

    print("KERNEL_OK")
</pallas_src>

<mosaic_0001>
module attributes {stable_mosaic.version = 11 : i64} {
  func.func @_mlp2_kernel(%arg0: i32, %arg1: memref<8x32xf32, #tpu.memory_space<vmem>>, %arg2: memref<32x128xf32, #tpu.memory_space<vmem>>, %arg3: memref<1x128xf32, #tpu.memory_space<vmem>>, %arg4: memref<1x128xf32, #tpu.memory_space<vmem>>, %arg5: memref<1x1xf32, #tpu.memory_space<vmem>>, %arg6: memref<1x1x8xf32, #tpu.memory_space<vmem>>) attributes {dimension_semantics = [#tpu.dimension_semantics<parallel>], iteration_bounds = array<i64: 1>, scalar_prefetch = 0 : i64, scratch_operands = 0 : i64, tpu.core_type = #tpu.core_type<tc>, window_params = [{transform_indices = @transform_0, window_bounds = array<i64: 8, 32>}, {pipeline_mode = #tpu.pipeline_mode<synchronous>, transform_indices = @transform_1, window_bounds = array<i64: 32, 128>}, {pipeline_mode = #tpu.pipeline_mode<synchronous>, transform_indices = @transform_2, window_bounds = array<i64: 1, 128>}, {pipeline_mode = #tpu.pipeline_mode<synchronous>, transform_indices = @transform_3, window_bounds = array<i64: 1, 128>}, {pipeline_mode = #tpu.pipeline_mode<synchronous>, transform_indices = @transform_4, window_bounds = array<i64: 1, 1>}, {transform_indices = @transform_5, window_bounds = array<i64: 1, 1, 8>}]} {
    %c0 = arith.constant 0 : index
    %c0_0 = arith.constant 0 : index
    %0 = vector.load %arg1[%c0, %c0_0] : memref<8x32xf32, #tpu.memory_space<vmem>>, vector<8x32xf32>
    %c0_1 = arith.constant 0 : index
    %c0_2 = arith.constant 0 : index
    %1 = vector.load %arg2[%c0_1, %c0_2] : memref<32x128xf32, #tpu.memory_space<vmem>>, vector<32x128xf32>
    %cst = arith.constant dense<0.000000e+00> : vector<8x128xf32>
    %2 = tpu.matmul %0, %1, %cst {dimension_numbers = #tpu.dot_dimension_numbers<[1], [0], [0], [1], [0, 0, 1, 1], [], []>} : vector<8x32xf32>, vector<32x128xf32>, vector<8x128xf32> -> vector<8x128xf32>
    %c0_3 = arith.constant 0 : index
    %c0_4 = arith.constant 0 : index
    %3 = vector.load %arg3[%c0_3, %c0_4] : memref<1x128xf32, #tpu.memory_space<vmem>>, vector<1x128xf32>
    %4 = vector.broadcast %3 : vector<1x128xf32> to vector<8x128xf32>
    %5 = arith.addf %2, %4 : vector<8x128xf32>
    %cst_5 = arith.constant 0.000000e+00 : f32
    %6 = vector.broadcast %cst_5 : f32 to vector<8x128xf32>
    %7 = arith.maximumf %5, %6 : vector<8x128xf32>
    %c0_6 = arith.constant 0 : index
    %c0_7 = arith.constant 0 : index
    %8 = vector.load %arg4[%c0_6, %c0_7] : memref<1x128xf32, #tpu.memory_space<vmem>>, vector<1x128xf32>
    %cst_8 = arith.constant dense<0.000000e+00> : vector<1x8xf32>
    %9 = tpu.matmul %8, %7, %cst_8 {dimension_numbers = #tpu.dot_dimension_numbers<[1], [1], [0], [0], [0, 0, 1, 0], [], []>} : vector<1x128xf32>, vector<8x128xf32>, vector<1x8xf32> -> vector<1x8xf32>
    %c0_9 = arith.constant 0 : index
    %c0_10 = arith.constant 0 : index
    %10 = vector.load %arg5[%c0_9, %c0_10] : memref<1x1xf32, #tpu.memory_space<vmem>>, vector<1x1xf32>
    %11 = vector.broadcast %10 : vector<1x1xf32> to vector<1x8xf32>
    %12 = arith.addf %9, %11 : vector<1x8xf32>
    %13 = math.tanh %12 : vector<1x8xf32>
    %c0_11 = arith.constant 0 : index
    %c0_12 = arith.constant 0 : index
    %c0_13 = arith.constant 0 : index
    %14 = vector.load %arg6[%c0_11, %c0_12, %c0_13] : memref<1x1x8xf32, #tpu.memory_space<vmem>>, vector<1x1x8xf32>
    %15 = vector.shape_cast %14 : vector<1x1x8xf32> to vector<1x8xf32>
    %16 = vector.shape_cast %13 : vector<1x8xf32> to vector<1x1x8xf32>
    tpu.vector_store %arg6[%c0_11, %c0_12, %c0_13], %16 {strides = array<i32>} : memref<1x1x8xf32, #tpu.memory_space<vmem>>, vector<1x1x8xf32>,
    return
  }
  func.func @transform_0(%arg0: i32) -> (i32, i32) {
    %c0_i32 = arith.constant 0 : i32
    %c0_i32_0 = arith.constant 0 : i32
    return %arg0, %c0_i32 : i32, i32
  }
  func.func @transform_1(%arg0: i32) -> (i32, i32) {
    %c0_i32 = arith.constant 0 : i32
    %c0_i32_0 = arith.constant 0 : i32
    %c0_i32_1 = arith.constant 0 : i32
    return %c0_i32, %c0_i32_0 : i32, i32
  }
  func.func @transform_2(%arg0: i32) -> (i32, i32) {
    %c0_i32 = arith.constant 0 : i32
    %c0_i32_0 = arith.constant 0 : i32
    %c0_i32_1 = arith.constant 0 : i32
    return %c0_i32, %c0_i32_0 : i32, i32
  }
  func.func @transform_3(%arg0: i32) -> (i32, i32) {
    %c0_i32 = arith.constant 0 : i32
    %c0_i32_0 = arith.constant 0 : i32
    %c0_i32_1 = arith.constant 0 : i32
    return %c0_i32, %c0_i32_0 : i32, i32
  }
  func.func @transform_4(%arg0: i32) -> (i32, i32) {
    %c0_i32 = arith.constant 0 : i32
    %c0_i32_0 = arith.constant 0 : i32
    %c0_i32_1 = arith.constant 0 : i32
    return %c0_i32, %c0_i32_0 : i32, i32
  }
  func.func @transform_5(%arg0: i32) -> (i32, i32, i32) {
    %c0_i32 = arith.constant 0 : i32
    %c0_i32_0 = arith.constant 0 : i32
    %c0_i32_1 = arith.constant 0 : i32
    return %arg0, %c0_i32, %c0_i32_0 : i32, i32, i32
  }
}

</mosaic_0001>

<bundles_post_ra>
// kernel: tpu_custom_call.1
= control target key start
LH: loop header
LB: loop body
LE: loop exit
PB: predicated region body
PF: predicated region fallthrough
CT: control target
= control target key end

     0   :  { %s279_s0 = inlined_call_operand.hbm [shape: f32[8,32], index: 0, kind: input, shape index: {}]   ;;  %s280_s1 = inlined_call_operand.hbm [shape: f32[32,128], index: 1, kind: input, shape index: {}]   ;;  %s281_s2 = inlined_call_operand.vmem [shape: f32[1,128], index: 2, kind: input, shape index: {}]   ;;  %s282_s3 = inlined_call_operand.vmem [shape: f32[1,128], index: 3, kind: input, shape index: {}]   ;;  %s283_s4 = inlined_call_operand.<no memory space> [shape: f32[1,1], index: 4, kind: input, shape index: {}]   ;;  %s284_s5 = inlined_call_operand.hbm [shape: f32[1,1,8], index: 5, kind: output, shape index: {}]  }
   0x1   :  { %v10_v0 = vstv %s283_s4 }
   0x2   :  { %11 = vst [vmem:[#allocation2] sm:$0x1] %v10_v0 }
   0x3   :  { %12 = vsyncpa [#allocation4], 0 }
   0x4   :  { %13 = vsyncpa [#allocation7], 0 }
   0x5   :  { %14 = vsyncpa [#allocation5], 0  ;;  %s20_s22 = sshll.u32 %s279_s0, 4  ;;  %s225_s23 = smov [#allocation3]   ;;  %s21_s22 = int_to_ptr.hbm [resolvable:$true] %s20_s22 }
   0x6   :  { %s22_s24 = sshll.u32 %s225_s23, 4  ;;  %s30_s27 = sshll.u32 %s280_s1, 4  ;;  %s23_s24 = int_to_ptr.vmem [resolvable:$true] %s22_s24  ;;  %s31_s27 = int_to_ptr.hbm [resolvable:$true] %s30_s27 }
   0x7   :  { %25 = dma.hbm_to_vmem [thread:$0]  %s21_s22, 128, %s23_s24, [#allocation4]  }
   0x8   :  { %s226_s28 = smov [#allocation6]   ;;  %s227_s29 = smov 128  }
   0x9   :  { %s32_s4 = sshll.u32 %s226_s28, 4  ;;  %s228_s30 = smov 8   ;;  %s33_s4 = int_to_ptr.vmem [resolvable:$true] %s32_s4 }
   0xa   :  { %38 = dma.hbm_to_vmem [thread:$0]  %s31_s27, 512, %s33_s4, [#allocation7], %s227_s29, %s227_s29, %s228_s30  }
   0xb   :  { %219 = dma.done.wait [#allocation4], 128  }
   0xc   :  { %220 = vsyncadd [#allocation4], 4294967168 }
   0xd   :  { %221 = dma.done.wait [#allocation7], 512  }
   0xe   :  { %222 = vsyncadd [#allocation7], 4294966784  ;;  %v57_v1 = vld [vmem:[#allocation6 + $0x18] sm:$0xff]  ;;  %v56_v2 = vld [vmem:[#allocation6 + $0x10] sm:$0xff]  ;;  %vm62_vm0 = vcmask 261120   ;;  %v229_v7 = vmov 0  }
   0xf   :  { %78 = vmatpush.msra.mxu0 %v57_v1  ;;  %v55_v3 = vld [vmem:[#allocation6 + $0x8] sm:$0xff]  ;;  %v54_v4 = vld [vmem:[#allocation6] sm:$0xff]  ;;  %v53_v5 = vld [vmem:[#allocation3] sm:$0xff]  ;;  %143 = vset.pattern.permute.xlu0 %v229_v7  ;;  %s230_s8 = smov [#allocation8]   ;;  %vm116_vm1 = vcmask 57344  }
  0x10   :  { %v88_v6 = vld [vmem:[#allocation2] sm:$0x1]  ;;  %s123_s9 = sshll.u32 %s230_s8, 4  ;;  %s124_s9 = int_to_ptr.vmem [resolvable:$true] %s123_s9 }
  0x11   :  { %79 = vmatpush.msra.mxu0 %v56_v2  ;;  %91 = vperm.xlu0 %143, %v88_v6   ;;  %v144_v8 = vld [vmem:[%s281_s2] ss:$0 sm:$0xff]  ;;  %s125_s2 = sshll.u32 %s284_s5, 4  ;;  %s126_s2 = int_to_ptr.hbm [resolvable:$true] %s125_s2 }
  0x12   :  { %v87_v12 = vld [vmem:[%s282_s3] sm:$0x1] }
  0x13   :  { %80 = vmatpush.msra.mxu0 %v55_v3 }
  0x15   :  { %81 = vmatpush.msra.mxu0 %v54_v4 }
  0x16   :  { %136 = vmatmul.msk.f32.vlgmr.msra.gmra.mxu0 %vm62_vm0, %v53_v5 }
  0x83   :  { %v92_v13 = vpop.permute.xlu0 %91 }
  0x84   :  { %v94_v14 = vperm.slane %v92_v13, 0 }
  0x93   :  { %v83_v9 = vpop.f32.mrf.mxu0 }
  0x94   :  { %v84_v10 = vadd.f32 %v144_v8, %v83_v9 }
  0x96   :  { %v86_v11 = vmax.f32 %v84_v10, 0.0 }
  0x98   :  { %110 = vmatpush.xpose.msra.mxu1 %v86_v11 }
  0x9b   :  { %111 = vmatmul.f32.vlgmr.msra.gmra.mxu1 %v87_v12 }
 0x118   :  { %v112_v15 = vpop.f32.mrf.mxu1 }
 0x119   :  { %v113_v16 = vadd.f32 %v112_v15, %v94_v14 }
 0x11b   :  { %145 = vtanh.f32 %v113_v16 }
 0x121   :  { %v146_v17 = vpop.eup %145 }
 0x122   :  { %117 = vst.msk [vmem:[#allocation8] sm:$0x1] %vm116_vm1, %v146_v17 }
 0x123   :  { %128 = dma.vmem_to_hbm [thread:$0]  %s124_s9, 16, %s126_s2, [#allocation5]  }
 0x124   :  { %223 = dma.done.wait [#allocation5], 16  }
 0x125   :  { %224 = vsyncadd [#allocation5], 4294967280 }
 0x126   :  { %133 = vsyncpa [#allocation4], 1 }
 0x127   :  { %134 = vsyncpa [#allocation7], 1 }
 0x128   :  { %135 = vsyncpa [#allocation5], 1 }

</bundles_post_ra>
